<compile_context>
chip_gen: v5e
topology: v5e:2x2
jax: 0.10.0
libtpu: 0.0.40
codegen_flags: <defaults>
</compile_context>

<pallas_src>
from functools import lru_cache

import numpy as np
import jax
import jax.numpy as jnp
from jax.experimental import pallas as pl
from jax.experimental.pallas import tpu as pltpu


# --------------------------------------------------------------------------
# Spherical 3x3x3 sampling-pattern generation (host-side numpy, mirrors the
# PyTorch reference).  cal_index / get_xy are the standard SphereNet 2D
# helpers the reference module depends on.
# --------------------------------------------------------------------------
@lru_cache(None)
def get_xy(delta_phi, delta_theta):
    return np.array([
        [
            (-np.tan(delta_theta), 1 / np.cos(delta_theta) * np.tan(delta_phi)),
            (0, np.tan(delta_phi)),
            (np.tan(delta_theta), 1 / np.cos(delta_theta) * np.tan(delta_phi)),
        ],
        [
            (-np.tan(delta_theta), 0),
            (1, 1),
            (np.tan(delta_theta), 0),
        ],
        [
            (-np.tan(delta_theta), -1 / np.cos(delta_theta) * np.tan(delta_phi)),
            (0, -np.tan(delta_phi)),
            (np.tan(delta_theta), -1 / np.cos(delta_theta) * np.tan(delta_phi)),
        ],
    ])


@lru_cache(None)
def cal_index(h, w, img_r, img_c):
    # pixel -> rad
    phi = -((img_r + 0.5) / h * np.pi - np.pi / 2)
    theta = (img_c + 0.5) / w * 2 * np.pi - np.pi
    delta_phi = np.pi / h
    delta_theta = 2 * np.pi / w
    xys = get_xy(delta_phi, delta_theta)
    x = xys[..., 0]
    y = xys[..., 1]
    rho = np.sqrt(x ** 2 + y ** 2)
    v = np.arctan(rho)
    new_phi = np.arcsin(np.cos(v) * np.sin(phi) + y * np.sin(v) * np.cos(phi) / rho)
    new_theta = theta + np.arctan(
        x * np.sin(v) / (rho * np.cos(phi) * np.cos(v) - y * np.sin(phi) * np.sin(v)))
    # rad -> pixel
    new_r = (-new_phi + np.pi / 2) * h / np.pi - 0.5
    new_c = (new_theta + np.pi) * w / 2 / np.pi - 0.5
    # equirectangular wrap-around on columns
    new_c = (new_c + w) % w
    new_result = np.stack([new_r, new_c], axis=-1)
    new_result[1, 1] = (img_r, img_c)
    return new_result


@lru_cache(None)
def cal_index_3d(t, h, w, img_t, img_r, img_c):
    idx_2d = cal_index(h, w, img_r, img_c)
    idx_2d = np.stack([idx_2d, idx_2d, idx_2d], axis=0)
    tt_shape = (3, 3, 1)
    tt_mat = np.stack([np.full(tt_shape, max(img_t - 1, 0)),
                       np.full(tt_shape, img_t),
                       np.full(tt_shape, min(img_t + 1, t - 1))], axis=0)
    res = np.concatenate([tt_mat, idx_2d], axis=3)
    return res


@lru_cache(None)
def _gen_filters_coordinates_3d(t, h, w, stride):
    co = np.array([[[cal_index_3d(t, h, w, tt, i, j)
                     for j in range(0, w, stride)]
                    for i in range(0, h, stride)]
                   for tt in range(0, t, stride)])
    return np.ascontiguousarray(co.transpose([6, 0, 1, 2, 3, 4, 5]))


def gen_filters_coordinates_3d(t, h, w, stride=1):
    assert isinstance(h, int) and isinstance(w, int) and isinstance(t, int)
    return _gen_filters_coordinates_3d(t, h, w, stride).copy()


def gen_grid_coordinates_3d(t, h, w, stride=1):
    coordinates = gen_filters_coordinates_3d(t, h, w, stride).copy()
    coordinates[0] = coordinates[0] * 2 / t - 1
    coordinates[1] = coordinates[1] * 2 / h - 1
    coordinates[2] = coordinates[2] * 2 / w - 1
    coordinates = coordinates[::-1]
    coordinates = coordinates.transpose(1, 4, 2, 5, 3, 6, 0)
    sz = coordinates.shape
    coordinates = coordinates.reshape(
        1, sz[0] * sz[1], sz[2] * sz[3], sz[4] * sz[5], sz[6])
    return coordinates.copy()


# --------------------------------------------------------------------------
# Factorized interpolation tables.
#
# For the SphereNet grid, the normalized (x, y) coordinates are independent of
# the output-frame index and the temporal window offset, and the normalized z
# coordinate is independent of the spatial position / spatial window offset.
# Trilinear grid_sample with zeros padding therefore factorizes exactly into
#   sample(kt, kh, kw; to, ho, wo)
#     = sum_z  wz(to, kt; z) * [ sum_{(y,x) corners} w2d(kh, kw; ho, wo) * X[z, y, x] ]
# We build:
#   w2d  : (9, H*W, Hc*Wc) dense 2D bilinear matrices (kh*3+kw major),
#   ztaps: per (kt, to) two (frame index, weight) taps.
# --------------------------------------------------------------------------
def build_factorized_tables(grid, in_shape):
    T, H, W = in_shape
    _, Dg, Hg, Wg, _ = grid.shape
    Tc, Hc, Wc = Dg // 3, Hg // 3, Wg // 3
    g = grid[0].reshape(Tc, 3, Hc, 3, Wc, 3, 3)   # (to, kt, ho, kh, wo, kw, xyz)

    # Factorization sanity: (x, y) independent of (to, kt); z independent of
    # the spatial indices.  Holds exactly for the SphereNet grid.
    assert np.allclose(g[..., 0:2], g[0:1, 0:1, :, :, :, :, 0:2])
    assert np.allclose(g[..., 2], g[:, :, 0:1, 0:1, 0:1, 0:1, 2])

    # ---- spatial (bilinear) part --------------------------------------
    g2 = g[0, 0]                                   # (ho, kh, wo, kw, xyz)
    ix = (g2[..., 0] + 1.0) * 0.5 * (W - 1)        # x -> width
    iy = (g2[..., 1] + 1.0) * 0.5 * (H - 1)        # y -> height
    ix = ix.transpose(1, 3, 0, 2).reshape(9, Hc * Wc)   # (khw, o_hw)
    iy = iy.transpose(1, 3, 0, 2).reshape(9, Hc * Wc)
    x0 = np.floor(ix).astype(np.int64)
    y0 = np.floor(iy).astype(np.int64)
    OHW = Hc * Wc
    w2d = np.zeros((9, H * W, OHW), dtype=np.float64)
    kk, oo = np.meshgrid(np.arange(9), np.arange(OHW), indexing="ij")
    for dy in (0, 1):
        for dx in (0, 1):
            xc, yc = x0 + dx, y0 + dy
            wgt = (1.0 - np.abs(ix - xc)) * (1.0 - np.abs(iy - yc))
            valid = (xc >= 0) & (xc < W) & (yc >= 0) & (yc < H)
            wgt = np.where(valid, wgt, 0.0)
            flat = np.clip(yc, 0, H - 1) * W + np.clip(xc, 0, W - 1)
            np.add.at(w2d, (kk.ravel(), flat.ravel(), oo.ravel()), wgt.ravel())

    # ---- temporal (2-tap linear) part ---------------------------------
    gz = g[:, :, 0, 0, 0, 0, 2]                    # (to, kt)
    iz = (gz + 1.0) * 0.5 * (T - 1)
    z0 = np.floor(iz).astype(np.int64)
    f = iz - z0
    w0 = 1.0 - f
    w1 = f
    z1 = z0 + 1
    w0 = np.where((z0 >= 0) & (z0 < T), w0, 0.0)
    w1 = np.where((z1 >= 0) & (z1 < T), w1, 0.0)
    z0c = np.clip(z0, 0, T - 1)
    z1c = np.clip(z1, 0, T - 1)
    ztaps = [[((int(z0c[to, kt]), float(w0[to, kt])),
               (int(z1c[to, kt]), float(w1[to, kt])))
              for to in range(Tc)]
             for kt in range(3)]

    return w2d.astype(np.float32), ztaps, (Tc, Hc, Wc)


def _round_up(n, m):
    return (n + m - 1) // m * m


# --------------------------------------------------------------------------
# Pallas kernel wrapper.
# Grid = (out_hw tiles [parallel], 9 spatial window points, H*W tiles).
# Per step: one (T*NCp, tk) x (tk, tn) bf16 MXU matmul accumulated in f32.
# When the contraction finishes, the 2-tap temporal mix + max over the 3
# temporal window points is done with static VMEM slices and the result is
# max-folded straight into the resident output block.
# --------------------------------------------------------------------------
def sphere_max_pool_3d(x, w2d, ztaps, out_spatial):
    N, C, T, H, W = (int(s) for s in x.shape)
    Tc, Hc, Wc = out_spatial
    NC = N * C
    NCp = _round_up(NC, 8)
    HW, OHW = H * W, Hc * Wc

    # Tile sizes: lane-dim multiples of 128, capped at 1024 (also 256-aligned
    # when shapes allow, per v6e/v7x MXU).  All blocks stay well under the
    # default scoped-VMEM limit on v5e/v6e/v7x, so no vmem_limit override is
    # needed at these tile sizes.
    tk = min(1024, _round_up(HW, 128))
    tn = min(1024, _round_up(OHW, 128))
    HWp = _round_up(HW, tk)
    OHWp = _round_up(OHW, tn)
    n_o = OHWp // tn
    n_r = HWp // tk

    # LHS rows = z * NCp + nc (frame-major) so each input frame is a
    # contiguous, 8-aligned sublane block inside the kernel.  bf16 for MXU.
    xr = jnp.transpose(x, (2, 0, 1, 3, 4)).reshape(T, NC, HW)
    xr = jnp.pad(xr, ((0, 0), (0, NCp - NC), (0, HWp - HW)))
    x_lhs = xr.reshape(T * NCp, HWp).astype(jnp.bfloat16)

    # 9 spatial interpolation matrices, zero-padded, bf16 (halves the
    # dominant HBM stream; accumulation stays f32).
    w2d_p = np.zeros((9, HWp, OHWp), dtype=np.float32)
    w2d_p[:, :HW, :OHW] = w2d
    w2d_dev = jnp.asarray(w2d_p, dtype=jnp.bfloat16)

    def kernel(x_ref, w_ref, o_ref, acc_ref):
        khw = pl.program_id(1)
        r = pl.program_id(2)

        @pl.when(r == 0)
        def _():
            acc_ref[...] = jnp.zeros_like(acc_ref)

        acc_ref[...] += jnp.dot(x_ref[...], w_ref[0],
                                preferred_element_type=jnp.float32)

        @pl.when(r == n_r - 1)
        def _():
            # Temporal 2-tap interpolation + max over the 3 temporal window
            # offsets, per output frame `to`.  Frame z of the per-frame 2D
            # samples lives in rows [z*NCp, (z+1)*NCp) of acc_ref.
            pieces = []
            for to in range(Tc):
                cand = None
                for kt in range(3):
                    (z0, wz0), (z1, wz1) = ztaps[kt][to]
                    y = acc_ref[z0 * NCp:(z0 + 1) * NCp, :] * wz0
                    if wz1 != 0.0:
                        y = y + acc_ref[z1 * NCp:(z1 + 1) * NCp, :] * wz1
                    cand = y if cand is None else jnp.maximum(cand, y)
                pieces.append(cand)

            # Fold into the resident output block (running max over the 9
            # spatial window points; initialized by the khw == 0 candidate).
            @pl.when(khw == 0)
            def _():
                for to in range(Tc):
                    o_ref[to * NCp:(to + 1) * NCp, :] = pieces[to]

            @pl.when(khw > 0)
            def _():
                for to in range(Tc):
                    prev = o_ref[to * NCp:(to + 1) * NCp, :]
                    o_ref[to * NCp:(to + 1) * NCp, :] = jnp.maximum(
                        prev, pieces[to])

    out2d = pl.pallas_call(
        kernel,
        out_shape=jax.ShapeDtypeStruct((Tc * NCp, OHWp), jnp.float32),
        grid_spec=pltpu.PrefetchScalarGridSpec(
            num_scalar_prefetch=0,
            grid=(n_o, 9, n_r),
            in_specs=[
                pl.BlockSpec((T * NCp, tk), lambda o, k, r: (0, r)),
                pl.BlockSpec((1, tk, tn), lambda o, k, r: (k, r, o)),
            ],
            out_specs=pl.BlockSpec((Tc * NCp, tn), lambda o, k, r: (0, o)),
            scratch_shapes=[pltpu.VMEM((T * NCp, tn), jnp.float32)],
        ),
        compiler_params=pltpu.CompilerParams(
            dimension_semantics=("parallel", "arbitrary", "arbitrary")),
    )(x_lhs, w2d_dev)

    out = out2d[:, :OHW].reshape(Tc, NCp, Hc, Wc)[:, :NC]
    out = out.reshape(Tc, N, C, Hc, Wc).transpose(1, 2, 0, 3, 4)
    return out.astype(x.dtype)


class SphereMaxPool3D:
    """Pallas/JAX port of the PyTorch SphereMaxPool3D (3x3x3 filter only)."""

    def __init__(self, stride=1, mode="bilinear"):
        assert mode == "bilinear"
        self.stride = stride
        self._cache = {}

    def __call__(self, x):
        shape = tuple(int(s) for s in x.shape[-3:])
        key = (shape, self.stride)
        if key not in self._cache:
            grid = gen_grid_coordinates_3d(shape[0], shape[1], shape[2],
                                           self.stride)
            self._cache[key] = build_factorized_tables(grid, shape)
        w2d, ztaps, out_spatial = self._cache[key]
        return sphere_max_pool_3d(x, w2d, ztaps, out_spatial)


# --------------------------------------------------------------------------
# Independent numpy reference: grid_sample (trilinear, align_corners=True,
# zeros padding) followed by MaxPool3d(kernel=3, stride=3).
# --------------------------------------------------------------------------
def grid_sample_3d_ref(x, grid):
    N, C, D, H, W = x.shape
    ix = (grid[..., 0] + 1.0) * 0.5 * (W - 1)
    iy = (grid[..., 1] + 1.0) * 0.5 * (H - 1)
    iz = (grid[..., 2] + 1.0) * 0.5 * (D - 1)
    x0 = np.floor(ix).astype(np.int64)
    y0 = np.floor(iy).astype(np.int64)
    z0 = np.floor(iz).astype(np.int64)
    out = np.zeros((N, C) + ix.shape[1:], dtype=np.float64)
    for dz in (0, 1):
        for dy in (0, 1):
            for dx in (0, 1):
                xc, yc, zc = x0 + dx, y0 + dy, z0 + dz
                w = ((1.0 - np.abs(ix - xc)) *
                     (1.0 - np.abs(iy - yc)) *
                     (1.0 - np.abs(iz - zc)))
                valid = ((xc >= 0) & (xc < W) & (yc >= 0) & (yc < H) &
                         (zc >= 0) & (zc < D))
                w = np.where(valid, w, 0.0)
                xcl = np.clip(xc, 0, W - 1)
                ycl = np.clip(yc, 0, H - 1)
                zcl = np.clip(zc, 0, D - 1)
                for n in range(N):
                    vals = x[n][:, zcl[n], ycl[n], xcl[n]]  # (C, Do, Ho, Wo)
                    out[n] += w[n][None] * vals
    return out


def maxpool3d_ref(y, k=3, s=3):
    N, C, D, H, W = y.shape
    Do, Ho, Wo = D // s, H // s, W // s
    yv = y[:, :, :Do * s, :Ho * s, :Wo * s].reshape(N, C, Do, s, Ho, s, Wo, s)
    return yv.max(axis=(3, 5, 7))


if __name__ == "__main__":
    key = jax.random.PRNGKey(0)
    N, C, T, H, W = 2, 4, 4, 8, 16
    x = jax.random.normal(key, (N, C, T, H, W), dtype=jnp.float32)

    pool = SphereMaxPool3D(stride=1, mode="bilinear")
    y = pool(x)
    y = jax.block_until_ready(y)

    # reference check (pure numpy, f64)
    grid = gen_grid_coordinates_3d(T, H, W, 1)          # (1, 3T, 3H, 3W, 3)
    grid_b = np.repeat(np.asarray(grid, np.float64), N, axis=0)
    sampled = grid_sample_3d_ref(np.asarray(x, np.float64), grid_b)
    ref = maxpool3d_ref(sampled)

    assert y.shape == ref.shape, (y.shape, ref.shape)
    # bf16 MXU operands (per perf review) -> ~1e-3..1e-2 abs error vs f64 ref.
    np.testing.assert_allclose(np.asarray(y), ref, rtol=3e-2, atol=3e-2)
    print("KERNEL_OK")
</pallas_src>

<mosaic_0001>
module attributes {stable_mosaic.version = 11 : i64} {
  func.func @kernel(%arg0: i32, %arg1: i32, %arg2: i32, %arg3: memref<32x128xbf16, #tpu.memory_space<vmem>>, %arg4: memref<1x128x128xbf16, #tpu.memory_space<vmem>>, %arg5: memref<32x128xf32, #tpu.memory_space<vmem>>, %arg6: memref<32x128xf32, #tpu.memory_space<vmem>>) attributes {dimension_semantics = [#tpu.dimension_semantics<parallel>, #tpu.dimension_semantics<arbitrary>, #tpu.dimension_semantics<arbitrary>], iteration_bounds = array<i64: 1, 9, 1>, scalar_prefetch = 0 : i64, scratch_operands = 1 : i64, tpu.core_type = #tpu.core_type<tc>, window_params = [{transform_indices = @transform_0, window_bounds = array<i64: 32, 128>}, {transform_indices = @transform_1, window_bounds = array<i64: 1, 128, 128>}, {transform_indices = @transform_2, window_bounds = array<i64: 32, 128>}]} {
    %c0_i32 = arith.constant 0 : i32
    %0 = arith.cmpi eq, %arg2, %c0_i32 : i32
    %1 = arith.extui %0 : i1 to i32
    %c0_i32_0 = arith.constant 0 : i32
    %2 = arith.cmpi ne, %1, %c0_i32_0 : i32
    scf.if %2 {
      %cst_11 = arith.constant 0.000000e+00 : f32
      %13 = vector.broadcast %cst_11 : f32 to vector<32x128xf32>
      %c0_12 = arith.constant 0 : index
      %c0_13 = arith.constant 0 : index
      %14 = vector.load %arg6[%c0_12, %c0_13] : memref<32x128xf32, #tpu.memory_space<vmem>>, vector<32x128xf32>
      tpu.vector_store %arg6[%c0_12, %c0_13], %13 {strides = array<i32>} : memref<32x128xf32, #tpu.memory_space<vmem>>, vector<32x128xf32>,
    } else {
    }
    %c0 = arith.constant 0 : index
    %c0_1 = arith.constant 0 : index
    %3 = vector.load %arg6[%c0, %c0_1] : memref<32x128xf32, #tpu.memory_space<vmem>>, vector<32x128xf32>
    %c0_2 = arith.constant 0 : index
    %c0_3 = arith.constant 0 : index
    %4 = vector.load %arg3[%c0_2, %c0_3] : memref<32x128xbf16, #tpu.memory_space<vmem>>, vector<32x128xbf16>
    %c0_4 = arith.constant 0 : index
    %c0_5 = arith.constant 0 : index
    %c0_6 = arith.constant 0 : index
    %5 = vector.load %arg4[%c0_4, %c0_5, %c0_6] : memref<1x128x128xbf16, #tpu.memory_space<vmem>>, vector<1x128x128xbf16>
    %6 = vector.shape_cast %5 : vector<1x128x128xbf16> to vector<128x128xbf16>
    %cst = arith.constant dense<0.000000e+00> : vector<32x128xf32>
    %7 = tpu.matmul %4, %6, %cst {dimension_numbers = #tpu.dot_dimension_numbers<[1], [0], [0], [1], [0, 0, 1, 1], [], []>} : vector<32x128xbf16>, vector<128x128xbf16>, vector<32x128xf32> -> vector<32x128xf32>
    %8 = arith.addf %3, %7 : vector<32x128xf32>
    %c0_7 = arith.constant 0 : index
    %c0_8 = arith.constant 0 : index
    %9 = vector.load %arg6[%c0_7, %c0_8] : memref<32x128xf32, #tpu.memory_space<vmem>>, vector<32x128xf32>
    tpu.vector_store %arg6[%c0_7, %c0_8], %8 {strides = array<i32>} : memref<32x128xf32, #tpu.memory_space<vmem>>, vector<32x128xf32>,
    %c0_i32_9 = arith.constant 0 : i32
    %10 = arith.cmpi eq, %arg2, %c0_i32_9 : i32
    %11 = arith.extui %10 : i1 to i32
    %c0_i32_10 = arith.constant 0 : i32
    %12 = arith.cmpi ne, %11, %c0_i32_10 : i32
    scf.if %12 {
      %c0_11 = arith.constant 0 : index
      %c0_12 = arith.constant 0 : index
      %13 = vector.load %arg6[%c0_11, %c0_12] : memref<32x128xf32, #tpu.memory_space<vmem>>, vector<8x128xf32>
      %cst_13 = arith.constant 1.000000e+00 : f32
      %14 = vector.broadcast %cst_13 : f32 to vector<8x128xf32>
      %15 = arith.mulf %13, %14 : vector<8x128xf32>
      %c0_14 = arith.constant 0 : index
      %c0_15 = arith.constant 0 : index
      %16 = vector.load %arg6[%c0_14, %c0_15] : memref<32x128xf32, #tpu.memory_space<vmem>>, vector<8x128xf32>
      %cst_16 = arith.constant 1.000000e+00 : f32
      %17 = vector.broadcast %cst_16 : f32 to vector<8x128xf32>
      %18 = arith.mulf %16, %17 : vector<8x128xf32>
      %19 = arith.maximumf %15, %18 : vector<8x128xf32>
      %c0_17 = arith.constant 0 : index
      %c0_18 = arith.constant 0 : index
      %20 = vector.load %arg6[%c0_17, %c0_18] : memref<32x128xf32, #tpu.memory_space<vmem>>, vector<8x128xf32>
      %cst_19 = arith.constant 2.500000e-01 : f32
      %21 = vector.broadcast %cst_19 : f32 to vector<8x128xf32>
      %22 = arith.mulf %20, %21 : vector<8x128xf32>
      %c8 = arith.constant 8 : index
      %c0_20 = arith.constant 0 : index
      %23 = vector.load %arg6[%c8, %c0_20] : memref<32x128xf32, #tpu.memory_space<vmem>>, vector<8x128xf32>
      %cst_21 = arith.constant 7.500000e-01 : f32
      %24 = vector.broadcast %cst_21 : f32 to vector<8x128xf32>
      %25 = arith.mulf %23, %24 : vector<8x128xf32>
      %26 = arith.addf %22, %25 : vector<8x128xf32>
      %27 = arith.maximumf %19, %26 : vector<8x128xf32>
      %c0_22 = arith.constant 0 : index
      %c0_23 = arith.constant 0 : index
      %28 = vector.load %arg6[%c0_22, %c0_23] : memref<32x128xf32, #tpu.memory_space<vmem>>, vector<8x128xf32>
      %cst_24 = arith.constant 1.000000e+00 : f32
      %29 = vector.broadcast %cst_24 : f32 to vector<8x128xf32>
      %30 = arith.mulf %28, %29 : vector<8x128xf32>
      %c0_25 = arith.constant 0 : index
      %c0_26 = arith.constant 0 : index
      %31 = vector.load %arg6[%c0_25, %c0_26] : memref<32x128xf32, #tpu.memory_space<vmem>>, vector<8x128xf32>
      %cst_27 = arith.constant 2.500000e-01 : f32
      %32 = vector.broadcast %cst_27 : f32 to vector<8x128xf32>
      %33 = arith.mulf %31, %32 : vector<8x128xf32>
      %c8_28 = arith.constant 8 : index
      %c0_29 = arith.constant 0 : index
      %34 = vector.load %arg6[%c8_28, %c0_29] : memref<32x128xf32, #tpu.memory_space<vmem>>, vector<8x128xf32>
      %cst_30 = arith.constant 7.500000e-01 : f32
      %35 = vector.broadcast %cst_30 : f32 to vector<8x128xf32>
      %36 = arith.mulf %34, %35 : vector<8x128xf32>
      %37 = arith.addf %33, %36 : vector<8x128xf32>
      %38 = arith.maximumf %30, %37 : vector<8x128xf32>
      %c8_31 = arith.constant 8 : index
      %c0_32 = arith.constant 0 : index
      %39 = vector.load %arg6[%c8_31, %c0_32] : memref<32x128xf32, #tpu.memory_space<vmem>>, vector<8x128xf32>
      %cst_33 = arith.constant 5.000000e-01 : f32
      %40 = vector.broadcast %cst_33 : f32 to vector<8x128xf32>
      %41 = arith.mulf %39, %40 : vector<8x128xf32>
      %c16 = arith.constant 16 : index
      %c0_34 = arith.constant 0 : index
      %42 = vector.load %arg6[%c16, %c0_34] : memref<32x128xf32, #tpu.memory_space<vmem>>, vector<8x128xf32>
      %cst_35 = arith.constant 5.000000e-01 : f32
      %43 = vector.broadcast %cst_35 : f32 to vector<8x128xf32>
      %44 = arith.mulf %42, %43 : vector<8x128xf32>
      %45 = arith.addf %41, %44 : vector<8x128xf32>
      %46 = arith.maximumf %38, %45 : vector<8x128xf32>
      %c0_36 = arith.constant 0 : index
      %c0_37 = arith.constant 0 : index
      %47 = vector.load %arg6[%c0_36, %c0_37] : memref<32x128xf32, #tpu.memory_space<vmem>>, vector<8x128xf32>
      %cst_38 = arith.constant 2.500000e-01 : f32
      %48 = vector.broadcast %cst_38 : f32 to vector<8x128xf32>
      %49 = arith.mulf %47, %48 : vector<8x128xf32>
      %c8_39 = arith.constant 8 : index
      %c0_40 = arith.constant 0 : index
      %50 = vector.load %arg6[%c8_39, %c0_40] : memref<32x128xf32, #tpu.memory_space<vmem>>, vector<8x128xf32>
      %cst_41 = arith.constant 7.500000e-01 : f32
      %51 = vector.broadcast %cst_41 : f32 to vector<8x128xf32>
      %52 = arith.mulf %50, %51 : vector<8x128xf32>
      %53 = arith.addf %49, %52 : vector<8x128xf32>
      %c8_42 = arith.constant 8 : index
      %c0_43 = arith.constant 0 : index
      %54 = vector.load %arg6[%c8_42, %c0_43] : memref<32x128xf32, #tpu.memory_space<vmem>>, vector<8x128xf32>
      %cst_44 = arith.constant 5.000000e-01 : f32
      %55 = vector.broadcast %cst_44 : f32 to vector<8x128xf32>
      %56 = arith.mulf %54, %55 : vector<8x128xf32>
      %c16_45 = arith.constant 16 : index
      %c0_46 = arith.constant 0 : index
      %57 = vector.load %arg6[%c16_45, %c0_46] : memref<32x128xf32, #tpu.memory_space<vmem>>, vector<8x128xf32>
      %cst_47 = arith.constant 5.000000e-01 : f32
      %58 = vector.broadcast %cst_47 : f32 to vector<8x128xf32>
      %59 = arith.mulf %57, %58 : vector<8x128xf32>
      %60 = arith.addf %56, %59 : vector<8x128xf32>
      %61 = arith.maximumf %53, %60 : vector<8x128xf32>
      %c16_48 = arith.constant 16 : index
      %c0_49 = arith.constant 0 : index
      %62 = vector.load %arg6[%c16_48, %c0_49] : memref<32x128xf32, #tpu.memory_space<vmem>>, vector<8x128xf32>
      %cst_50 = arith.constant 7.500000e-01 : f32
      %63 = vector.broadcast %cst_50 : f32 to vector<8x128xf32>
      %64 = arith.mulf %62, %63 : vector<8x128xf32>
      %c24 = arith.constant 24 : index
      %c0_51 = arith.constant 0 : index
      %65 = vector.load %arg6[%c24, %c0_51] : memref<32x128xf32, #tpu.memory_space<vmem>>, vector<8x128xf32>
      %cst_52 = arith.constant 2.500000e-01 : f32
      %66 = vector.broadcast %cst_52 : f32 to vector<8x128xf32>
      %67 = arith.mulf %65, %66 : vector<8x128xf32>
      %68 = arith.addf %64, %67 : vector<8x128xf32>
      %69 = arith.maximumf %61, %68 : vector<8x128xf32>
      %c8_53 = arith.constant 8 : index
      %c0_54 = arith.constant 0 : index
      %70 = vector.load %arg6[%c8_53, %c0_54] : memref<32x128xf32, #tpu.memory_space<vmem>>, vector<8x128xf32>
      %cst_55 = arith.constant 5.000000e-01 : f32
      %71 = vector.broadcast %cst_55 : f32 to vector<8x128xf32>
      %72 = arith.mulf %70, %71 : vector<8x128xf32>
      %c16_56 = arith.constant 16 : index
      %c0_57 = arith.constant 0 : index
      %73 = vector.load %arg6[%c16_56, %c0_57] : memref<32x128xf32, #tpu.memory_space<vmem>>, vector<8x128xf32>
      %cst_58 = arith.constant 5.000000e-01 : f32
      %74 = vector.broadcast %cst_58 : f32 to vector<8x128xf32>
      %75 = arith.mulf %73, %74 : vector<8x128xf32>
      %76 = arith.addf %72, %75 : vector<8x128xf32>
      %c16_59 = arith.constant 16 : index
      %c0_60 = arith.constant 0 : index
      %77 = vector.load %arg6[%c16_59, %c0_60] : memref<32x128xf32, #tpu.memory_space<vmem>>, vector<8x128xf32>
      %cst_61 = arith.constant 7.500000e-01 : f32
      %78 = vector.broadcast %cst_61 : f32 to vector<8x128xf32>
      %79 = arith.mulf %77, %78 : vector<8x128xf32>
      %c24_62 = arith.constant 24 : index
      %c0_63 = arith.constant 0 : index
      %80 = vector.load %arg6[%c24_62, %c0_63] : memref<32x128xf32, #tpu.memory_space<vmem>>, vector<8x128xf32>
      %cst_64 = arith.constant 2.500000e-01 : f32
      %81 = vector.broadcast %cst_64 : f32 to vector<8x128xf32>
      %82 = arith.mulf %80, %81 : vector<8x128xf32>
      %83 = arith.addf %79, %82 : vector<8x128xf32>
      %84 = arith.maximumf %76, %83 : vector<8x128xf32>
      %c16_65 = arith.constant 16 : index
      %c0_66 = arith.constant 0 : index
      %85 = vector.load %arg6[%c16_65, %c0_66] : memref<32x128xf32, #tpu.memory_space<vmem>>, vector<8x128xf32>
      %cst_67 = arith.constant 7.500000e-01 : f32
      %86 = vector.broadcast %cst_67 : f32 to vector<8x128xf32>
      %87 = arith.mulf %85, %86 : vector<8x128xf32>
      %c24_68 = arith.constant 24 : index
      %c0_69 = arith.constant 0 : index
      %88 = vector.load %arg6[%c24_68, %c0_69] : memref<32x128xf32, #tpu.memory_space<vmem>>, vector<8x128xf32>
      %cst_70 = arith.constant 2.500000e-01 : f32
      %89 = vector.broadcast %cst_70 : f32 to vector<8x128xf32>
      %90 = arith.mulf %88, %89 : vector<8x128xf32>
      %91 = arith.addf %87, %90 : vector<8x128xf32>
      %92 = arith.maximumf %84, %91 : vector<8x128xf32>
      %c0_i32_71 = arith.constant 0 : i32
      %93 = arith.cmpi eq, %arg1, %c0_i32_71 : i32
      %94 = arith.extui %93 : i1 to i32
      %c0_i32_72 = arith.constant 0 : i32
      %95 = arith.cmpi ne, %94, %c0_i32_72 : i32
      scf.if %95 {
        %c0_75 = arith.constant 0 : index
        %c0_76 = arith.constant 0 : index
        %99 = vector.load %arg5[%c0_75, %c0_76] : memref<32x128xf32, #tpu.memory_space<vmem>>, vector<8x128xf32>
        tpu.vector_store %arg5[%c0_75, %c0_76], %27 {strides = array<i32>} : memref<32x128xf32, #tpu.memory_space<vmem>>, vector<8x128xf32>,
        %c8_77 = arith.constant 8 : index
        %c0_78 = arith.constant 0 : index
        %100 = vector.load %arg5[%c8_77, %c0_78] : memref<32x128xf32, #tpu.memory_space<vmem>>, vector<8x128xf32>
        tpu.vector_store %arg5[%c8_77, %c0_78], %46 {strides = array<i32>} : memref<32x128xf32, #tpu.memory_space<vmem>>, vector<8x128xf32>,
        %c16_79 = arith.constant 16 : index
        %c0_80 = arith.constant 0 : index
        %101 = vector.load %arg5[%c16_79, %c0_80] : memref<32x128xf32, #tpu.memory_space<vmem>>, vector<8x128xf32>
        tpu.vector_store %arg5[%c16_79, %c0_80], %69 {strides = array<i32>} : memref<32x128xf32, #tpu.memory_space<vmem>>, vector<8x128xf32>,
        %c24_81 = arith.constant 24 : index
        %c0_82 = arith.constant 0 : index
        %102 = vector.load %arg5[%c24_81, %c0_82] : memref<32x128xf32, #tpu.memory_space<vmem>>, vector<8x128xf32>
        tpu.vector_store %arg5[%c24_81, %c0_82], %92 {strides = array<i32>} : memref<32x128xf32, #tpu.memory_space<vmem>>, vector<8x128xf32>,
      } else {
      }
      %c0_i32_73 = arith.constant 0 : i32
      %96 = arith.cmpi sgt, %arg1, %c0_i32_73 : i32
      %97 = arith.extui %96 : i1 to i32
      %c0_i32_74 = arith.constant 0 : i32
      %98 = arith.cmpi ne, %97, %c0_i32_74 : i32
      scf.if %98 {
        %c0_75 = arith.constant 0 : index
        %c0_76 = arith.constant 0 : index
        %99 = vector.load %arg5[%c0_75, %c0_76] : memref<32x128xf32, #tpu.memory_space<vmem>>, vector<8x128xf32>
        %100 = arith.maximumf %99, %27 : vector<8x128xf32>
        %c0_77 = arith.constant 0 : index
        %c0_78 = arith.constant 0 : index
        %101 = vector.load %arg5[%c0_77, %c0_78] : memref<32x128xf32, #tpu.memory_space<vmem>>, vector<8x128xf32>
        tpu.vector_store %arg5[%c0_77, %c0_78], %100 {strides = array<i32>} : memref<32x128xf32, #tpu.memory_space<vmem>>, vector<8x128xf32>,
        %c8_79 = arith.constant 8 : index
        %c0_80 = arith.constant 0 : index
        %102 = vector.load %arg5[%c8_79, %c0_80] : memref<32x128xf32, #tpu.memory_space<vmem>>, vector<8x128xf32>
        %103 = arith.maximumf %102, %46 : vector<8x128xf32>
        %c8_81 = arith.constant 8 : index
        %c0_82 = arith.constant 0 : index
        %104 = vector.load %arg5[%c8_81, %c0_82] : memref<32x128xf32, #tpu.memory_space<vmem>>, vector<8x128xf32>
        tpu.vector_store %arg5[%c8_81, %c0_82], %103 {strides = array<i32>} : memref<32x128xf32, #tpu.memory_space<vmem>>, vector<8x128xf32>,
        %c16_83 = arith.constant 16 : index
        %c0_84 = arith.constant 0 : index
        %105 = vector.load %arg5[%c16_83, %c0_84] : memref<32x128xf32, #tpu.memory_space<vmem>>, vector<8x128xf32>
        %106 = arith.maximumf %105, %69 : vector<8x128xf32>
        %c16_85 = arith.constant 16 : index
        %c0_86 = arith.constant 0 : index
        %107 = vector.load %arg5[%c16_85, %c0_86] : memref<32x128xf32, #tpu.memory_space<vmem>>, vector<8x128xf32>
        tpu.vector_store %arg5[%c16_85, %c0_86], %106 {strides = array<i32>} : memref<32x128xf32, #tpu.memory_space<vmem>>, vector<8x128xf32>,
        %c24_87 = arith.constant 24 : index
        %c0_88 = arith.constant 0 : index
        %108 = vector.load %arg5[%c24_87, %c0_88] : memref<32x128xf32, #tpu.memory_space<vmem>>, vector<8x128xf32>
        %109 = arith.maximumf %108, %92 : vector<8x128xf32>
        %c24_89 = arith.constant 24 : index
        %c0_90 = arith.constant 0 : index
        %110 = vector.load %arg5[%c24_89, %c0_90] : memref<32x128xf32, #tpu.memory_space<vmem>>, vector<8x128xf32>
        tpu.vector_store %arg5[%c24_89, %c0_90], %109 {strides = array<i32>} : memref<32x128xf32, #tpu.memory_space<vmem>>, vector<8x128xf32>,
      } else {
      }
    } else {
    }
    return
  }
  func.func @transform_0(%arg0: i32, %arg1: i32, %arg2: i32) -> (i32, i32) {
    %c0_i32 = arith.constant 0 : i32
    %c0_i32_0 = arith.constant 0 : i32
    return %c0_i32, %arg2 : i32, i32
  }
  func.func @transform_1(%arg0: i32, %arg1: i32, %arg2: i32) -> (i32, i32, i32) {
    %c0_i32 = arith.constant 0 : i32
    return %arg1, %arg2, %arg0 : i32, i32, i32
  }
  func.func @transform_2(%arg0: i32, %arg1: i32, %arg2: i32) -> (i32, i32) {
    %c0_i32 = arith.constant 0 : i32
    %c0_i32_0 = arith.constant 0 : i32
    return %c0_i32, %arg0 : i32, i32
  }
}

</mosaic_0001>

<bundles_post_ra>
// kernel: tpu_custom_call.1
= control target key start
LH: loop header
LB: loop body
LE: loop exit
PB: predicated region body
PF: predicated region fallthrough
CT: control target
= control target key end

     0   :  { %7 = vsyncpa [#allocation4], 0  ;;  %s904_s0 = inlined_call_operand.hbm [shape: bf16[32,128], index: 0, kind: input, shape index: {}]   ;;  %s905_s1 = inlined_call_operand.hbm [shape: bf16[9,128,128], index: 1, kind: input, shape index: {}]   ;;  %s906_s2 = inlined_call_operand.hbm [shape: f32[32,128], index: 2, kind: output, shape index: {}]  }
   0x1   :  { %8 = vsyncpa [#allocation7], 0 }
   0x2   :  { %10 = vsyncpa [#allocation7 + $0x1], 0 }
   0x3   :  { %11 = vsyncpa [#allocation5], 0  ;;  %s789_s9 = smov 0   ;;  %s791_s10 = smov 0  }
   0x4   :  { %s793_s11 = smov 0   ;;  %s795_s12 = smov 0  }
   0x5   :  { %s797_s13 = smov 0   ;;  %s799_s14 = smov 0  }
   0x6 LB: > { %s468_s15 = sadd.s32 4294967295, %s766_s14   ;;  %p86_p0 = scmp.ne.s32.totalorder %s750_s10, %s746_s9  ;;  %s766_s14 = sphi %s799_s14, %s17_s14   ;;  %s762_s13 = sphi %s797_s13, %s915_s13   ;;  %s758_s12 = sphi %s795_s12, %s914_s12   ;;  %s754_s11 = sphi %s793_s11, %s913_s11   ;;  %s750_s10 = sphi %s791_s10, %s912_s10   ;;  %s746_s9 = sphi %s789_s9, %s911_s9  }
   0x7   : > { %p821_p1 = scmp.eq.s32.totalorder %s468_s15, 0  ;;  %p469_p2 = scmp.ge.s32.totalorder %s766_s14, 1 }
   0x8   : > { %p123_p3 = scmp.lt.s32.totalorder %s766_s14, 10  ;;  %s136_s20 = sshll.u32 %s904_s0, 4  ;;  %s137_s20 = int_to_ptr.hbm [resolvable:$true] %s136_s20 }
   0x9   : > { %p829_p4 = por %p821_p1, %p86_p0  ;;  %s768_s22 = smov [#allocation3]  }
   0xa   : > { %p836_p5 = pnand %p469_p2, %p123_p3  ;;  %s138_s23 = sshll.u32 %s768_s22, 4  ;;  %s139_s23 = int_to_ptr.vmem [resolvable:$true] %s138_s23 }
   0xb   : > { %s769_s24 = smov 64   ;;  %s770_s25 = smov 4  }
   0xc   : > { %p553_p6 = pneg %p836_p5  ;;  %s32_s26 = sadd.s32 1, %s762_s13 }
   0xd   : > { %p34_p8 = scmp.ge.s32.totalorder %s32_s26, 9  ;;  %p80_p9 = scmp.ne.s32.totalorder %s754_s11, %s750_s10 }
   0xe   : > { %p554_p7 = pnand %p553_p6, %p821_p1  ;;  %p81_p10 = scmp.eq.s32.totalorder %s766_s14, 0 }
   0xf   : > { %s917_s26 = smov (%p34_p8, %s32_s26), 0  ;;  %s73_s27 = sadd.s32 1, %s754_s11 }
  0x10   : > { %556 = dma.hbm_to_vmem [thread:$0]  (!%p554_p7), %s137_s20, 256, %s139_s23, [#allocation4], %s769_s24, %s769_s24, %s770_s25  }
  0x11   : > { %p851_p11 = por %p81_p10, %p80_p9  ;;  %s66_s29 = ssub.s32 %s762_s13, %s917_s26 }
  0x12   : > { %s152_s30 = sand.u32 1, %s754_s11   ;;  %p71_p12 = scmp.eq.s32.totalorder %s66_s29, 0 }
  0x13   : > { %p562_p13 = scmp.lt.s32.totalorder %s766_s14, 9  ;;  %s472_s3 = sshll.u32 %s152_s30, 6 }
  0x14   : > { %s524_s4 = sshll.u32 %s762_s13, 6  ;;  %s156_s18 = scalar_lea.vmem [#allocation6], %s472_s3 }
  0x15   : > { %s861_s5 = scalar_select %p71_p12, %s754_s11, %s73_s27  }
  0x16   : > { %s164_s8 = scalar_lea.hbm %s905_s1, %s524_s4  ;;  %s167_s19 = sshll.u32 %s156_s18, 4  ;;  %s168_s19 = int_to_ptr.vmem [resolvable:$true] %s167_s19 }
  0x17   : > { %s165_s9 = sshll.u32 %s164_s8, 4  ;;  %p558_p0 = pnand %p562_p13, %p851_p11  ;;  %s166_s9 = int_to_ptr.hbm [resolvable:$true] %s165_s9 }
  0x18   : > { %s153_s20 = scalar_lea.sflag [#allocation7], %s152_s30  ;;  %179 = sbr.rel (%p836_p5) target bundleno = 231 (0xe7), region = 28 }
  0x19   : > { %560 = dma.hbm_to_vmem [thread:$0]  (!%p558_p0), %s166_s9, 1024, %s168_s19, %s153_s20, %s769_s24, %s769_s24, %s770_s25  }
  0x1d   : > { %733 = dma.done.wait (%p821_p1), [#allocation4], 256  }
  0x1e   : > { %735 = vsyncadd (%p821_p1), [#allocation4], 4294967040  ;;  %s186_s22 = sand.u32 1, %s750_s10  }
  0x1f   : > { %s477_s23 = sshll.u32 %s186_s22, 6  ;;  %s187_s27 = scalar_lea.sflag [#allocation7], %s186_s22 }
  0x20   : > { %s190_s29 = scalar_lea.vmem [#allocation6], %s477_s23 }
  0x21   : > { %737 = dma.done.wait (%p829_p4), %s187_s27, 1024  }
  0x22   : > { %739 = vsyncadd (%p829_p4), %s187_s27, 4294966272  ;;  %v534_v0 = vld [vmem:[%s190_s29 + $0x38] sm:$0xff]  ;;  %v533_v1 = vld [vmem:[%s190_s29 + $0x30] sm:$0xff]  ;;  %p518_p1 = scmp.ne.s32.totalorder %s758_s12, 0 }
  0x23   : > { %300 = vmatpush.bf16.msra.mxu0 %v534_v0  ;;  %535 = vmatpush.bf16.msra.mxu1 %v534_v0  ;;  %v532_v2 = vld [vmem:[%s190_s29 + $0x28] sm:$0xff]  ;;  %v531_v3 = vld [vmem:[%s190_s29 + $0x20] sm:$0xff]  ;;  %v530_v4 = vld [vmem:[%s190_s29 + $0x18] sm:$0xff] }
  0x24   : > { %v529_v5 = vld [vmem:[%s190_s29 + $0x10] sm:$0xff]  ;;  %v528_v6 = vld [vmem:[%s190_s29 + $0x8] sm:$0xff]  ;;  %v527_v7 = vld [vmem:[%s190_s29] sm:$0xff] }
  0x25   : > { %v525_v8 = vld [vmem:[#allocation3] sm:$0xff]  ;;  %v526_v9 = vld [vmem:[#allocation3 + $0x8] sm:$0xff] }
  0x27   : > { %301 = vmatpush.bf16.msra.mxu0 %v533_v1  ;;  %536 = vmatpush.bf16.msra.mxu1 %v533_v1 }
  0x2b   : > { %302 = vmatpush.bf16.msra.mxu0 %v532_v2  ;;  %537 = vmatpush.bf16.msra.mxu1 %v532_v2 }
  0x2f   : > { %303 = vmatpush.bf16.msra.mxu0 %v531_v3  ;;  %538 = vmatpush.bf16.msra.mxu1 %v531_v3 }
  0x33   : > { %304 = vmatpush.bf16.msra.mxu0 %v530_v4  ;;  %539 = vmatpush.bf16.msra.mxu1 %v530_v4 }
  0x37   : > { %305 = vmatpush.bf16.msra.mxu0 %v529_v5  ;;  %540 = vmatpush.bf16.msra.mxu1 %v529_v5 }
  0x3b   : > { %306 = vmatpush.bf16.msra.mxu0 %v528_v6  ;;  %541 = vmatpush.bf16.msra.mxu1 %v528_v6 }
  0x3f   : > { %307 = vmatpush.bf16.msra.mxu0 %v527_v7  ;;  %542 = vmatpush.bf16.msra.mxu1 %v527_v7 }
  0x42   : > { %308 = vmatmul.bf16.vlgmr.msra.gmra.mxu0 %v525_v8  ;;  %313 = vmatmul.bf16.vlgmr.msra.gmra.mxu1 %v526_v9 }
  0xbf   : > { %v309_v10 = vpop.f32.mrf.mxu0  ;;  %v314_v11 = vpop.f32.mrf.mxu1 }
  0xc0   : > { %v331_v12 = vmul.f32 0.25, %v309_v10  ;;  %v338_v13 = vmul.f32 0.5, %v314_v11  ;;  %v342_v16 = vmul.f32 0.75, %v314_v11 }
  0xc7   : > { %v311_v14 = vpop.f32.mrf.mxu0  ;;  %v316_v15 = vpop.f32.mrf.mxu1 }
  0xc8   : > { %v333_v17 = vmul.f32 0.75, %v311_v14  ;;  %v336_v18 = vmul.f32 0.5, %v311_v14  ;;  %v344_v19 = vmul.f32 0.25, %v316_v15 }
  0xca   : > { %v334_v20 = vadd.f32 %v333_v17, %v331_v12  ;;  %v339_v21 = vadd.f32 %v338_v13, %v336_v18  ;;  %v345_v22 = vadd.f32 %v344_v19, %v342_v16  ;;  %352 = sbr.rel (%p518_p1) target bundleno = 211 (0xd3), region = 48 }
  0xcc   : > { %v335_v23 = vmax.f32 %v309_v10, %v334_v20  ;;  %v341_v24 = vmax.f32 %v334_v20, %v339_v21  ;;  %v347_v25 = vmax.f32 %v339_v21, %v345_v22 }
  0xce   : > { %v340_v26 = vmax.f32 %v335_v23, %v339_v21  ;;  %v346_v27 = vmax.f32 %v341_v24, %v345_v22  ;;  %v348_v28 = vmax.f32 %v347_v25, %v345_v22 }
  0xcf   : > { %353 = vst [vmem:[#allocation8] sm:$0xff] %v335_v23 }
  0xd0   : > { %354 = vst [vmem:[#allocation8 + $0x8] sm:$0xff] %v340_v26 }
  0xd1   : > { %355 = vst [vmem:[#allocation8 + $0x10] sm:$0xff] %v346_v27 }
  0xd2   : > { %356 = vst [vmem:[#allocation8 + $0x18] sm:$0xff] %v348_v28 }
  0xd3 PF: > { %p519_p2 = scmp.le.s32.totalorder %s758_s12, 0 }
  0xd5   : > { %360 = sbr.rel (%p519_p2) target bundleno = 225 (0xe1), region = 52 }
  0xda   : > { %v361_v29 = vld [vmem:[#allocation8] sm:$0xff]  ;;  %v364_v30 = vld [vmem:[#allocation8 + $0x8] sm:$0xff]  ;;  %v367_v31 = vld [vmem:[#allocation8 + $0x10] sm:$0xff] }
  0xdb   : > { %v362_v32 = vmax.f32 %v361_v29, %v335_v23  ;;  %v365_v33 = vmax.f32 %v364_v30, %v340_v26  ;;  %v368_v34 = vmax.f32 %v367_v31, %v346_v27  ;;  %v370_v35 = vld [vmem:[#allocation8 + $0x18] sm:$0xff] }
  0xdc   : > { %v371_v36 = vmax.f32 %v370_v35, %v348_v28 }
  0xdd   : > { %363 = vst [vmem:[#allocation8] sm:$0xff] %v362_v32 }
  0xde   : > { %366 = vst [vmem:[#allocation8 + $0x8] sm:$0xff] %v365_v33 }
  0xdf   : > { %369 = vst [vmem:[#allocation8 + $0x10] sm:$0xff] %v368_v34 }
  0xe0   : > { %372 = vst [vmem:[#allocation8 + $0x18] sm:$0xff] %v371_v36 }
  0xe1 PF: > { %p564_p3 = scmp.eq.s32.totalorder %s468_s15, 8  ;;  %s382_s12 = sshll.u32 %s906_s2, 4  ;;  %s383_s12 = int_to_ptr.hbm [resolvable:$true] %s382_s12 }
  0xe2   : > { %s771_s21 = smov [#allocation8]   ;;  %s772_s25 = smov 128  }
  0xe3   : > { %s380_s24 = sshll.u32 %s771_s21, 4  ;;  %s773_s28 = smov 8   ;;  %s381_s24 = int_to_ptr.vmem [resolvable:$true] %s380_s24 }
  0xe4   : > { %550 = dma.vmem_to_hbm [thread:$0]  (%p564_p3), %s381_s24, 512, %s383_s12, [#allocation5], %s772_s25, %s772_s25, %s773_s28  }
  0xe5   : > { %741 = dma.done.wait (%p564_p3), [#allocation5], 512  }
  0xe6   : > { %743 = vsyncadd (%p564_p3), [#allocation5], 4294966784 }
  0xe7 PF: > { %s17_s14 = sadd.s32 1, %s766_s14   ;;  %s911_s9 = smov %s750_s10 }
  0xe8   : > { %p14_p4 = scmp.ge.s32.totalorder %s17_s14, 11   ;;  %s912_s10 = smov %s754_s11 }
  0xe9   : > { %s913_s11 = smov %s861_s5  ;;  %s914_s12 = smov %s762_s13 }
  0xea   : > { %s915_s13 = smov %s917_s26  ;;  %16 = sbr.rel (!%p14_p4) target bundleno = 6 (0x6), region = 88 }
  0xef   :  { %399 = vsyncpa [#allocation4], 1 }
  0xf0   :  { %401 = vsyncpa [#allocation4 + $0x1], 1 }
  0xf1   :  { %402 = vsyncpa [#allocation7], 1 }
  0xf2   :  { %404 = vsyncpa [#allocation7 + $0x1], 1 }
  0xf3   :  { %405 = vsyncpa [#allocation5], 1 }
  0xf4   :  { %407 = vsyncpa [#allocation5 + $0x1], 1 }

</bundles_post_ra>
